<compile_context>
chip_gen: v5e
topology: v5e:2x2
jax: 0.10.0
libtpu: 0.0.40
codegen_flags: <defaults>
</compile_context>

<pallas_src>
import functools

import jax
import jax.numpy as jnp
from jax.experimental import pallas as pl
from jax.experimental.pallas import tpu as pltpu


# ----------------------------------------------------------------------------
# Pallas kernel: fused 1x1-conv (VPU FMAs) + bias + in-kernel uv + delta slice
# ----------------------------------------------------------------------------
def _semiconv_kernel(x_ref, wt_ref, b_ref, out_ref, delta_ref, *, H, W):
    # x_ref:     (1, Cin, tm)    VMEM  -- pixels on lanes
    # wt_ref:    (Cin, Cout, 1)  VMEM  -- gate-folded weight, column per k
    # b_ref:     (Cout, 1)       VMEM  -- gate-folded bias
    # out_ref:   (1, Cout, tm)   VMEM
    # delta_ref: (1, 2, tm)      VMEM
    x = x_ref[0]                      # (Cin, tm)
    Cin = x.shape[0]
    tm = x.shape[1]
    Cout = out_ref.shape[1]

    # Tiny channel contraction on the VPU: y[o, p] = sum_k w[o, k] * x[k, p].
    # Unrolled over Cin as broadcast outer-products; no MXU involved.
    acc = None
    for k in range(Cin):              # static unroll (Cin is tiny)
        term = wt_ref[k] * x[k:k + 1, :]          # (Cout,1) * (1,tm) -> (Cout,tm)
        acc = term if acc is None else acc + term
    y = acc + b_ref[...]              # (Cout, tm) + (Cout, 1)  [gated conv output]

    # delta = last two channels of the gated conv output (before the uv add).
    delta_ref[0] = y[Cout - 2:, :]

    # Synthesize uv in-kernel: channel Cout-2 = row coord, Cout-1 = col coord,
    # all other channels zero.  coord(i, n) = -1 + 2*i/(n-1)  (== linspace).
    j = pl.program_id(1)              # pixel-tile index within the image
    pix = (j * tm + jax.lax.broadcasted_iota(jnp.int32, (1, tm), 1)).astype(jnp.float32)
    h = jnp.floor(pix / jnp.float32(W))           # row index   (exact for pix < 2^24)
    wc = pix - h * jnp.float32(W)                 # col index
    row_c = h * jnp.float32(2.0 / (H - 1)) - 1.0  # (1, tm)
    col_c = wc * jnp.float32(2.0 / (W - 1)) - 1.0 # (1, tm)

    ch = jax.lax.broadcasted_iota(jnp.int32, (Cout, tm), 0)
    uv = jnp.where(ch == Cout - 2, row_c, jnp.float32(0.0))
    uv = jnp.where(ch == Cout - 1, col_c, uv)

    out_ref[0] = y + uv


def _pick_tile(hw, cap=2048):
    """Largest legal pixel tile: full image if small, else a /128 divisor."""
    if hw <= cap:
        return hw                      # block dim == full array dim -> legal
    t = (cap // 128) * 128
    while t >= 128:
        if hw % t == 0:
            return t
        t -= 128
    return hw                          # fallback: whole image per grid step


def semiconv_pallas(x_flat, wt, b, *, H, W, tm):
    """x_flat: (N, Cin, H*W); wt: (Cin, Cout, 1); b: (Cout, 1)."""
    N, Cin, HW = x_flat.shape
    Cout = wt.shape[1]
    assert HW % tm == 0

    grid_spec = pltpu.PrefetchScalarGridSpec(
        num_scalar_prefetch=0,
        grid=(N, HW // tm),
        in_specs=[
            pl.BlockSpec((1, Cin, tm), lambda n, j: (n, 0, j)),   # x tile
            pl.BlockSpec((Cin, Cout, 1), lambda n, j: (0, 0, 0)), # weight (resident)
            pl.BlockSpec((Cout, 1), lambda n, j: (0, 0)),         # bias (resident)
        ],
        out_specs=[
            pl.BlockSpec((1, Cout, tm), lambda n, j: (n, 0, j)),  # out + uv
            pl.BlockSpec((1, 2, tm), lambda n, j: (n, 0, j)),     # delta
        ],
    )
    kernel = functools.partial(_semiconv_kernel, H=H, W=W)
    return pl.pallas_call(
        kernel,
        grid_spec=grid_spec,
        out_shape=(
            jax.ShapeDtypeStruct((N, Cout, HW), jnp.float32),
            jax.ShapeDtypeStruct((N, 2, HW), jnp.float32),
        ),
        compiler_params=pltpu.CompilerParams(
            dimension_semantics=("parallel", "parallel"),
        ),
    )(x_flat, wt, b)


# ----------------------------------------------------------------------------
# Glue: parameter construction + NCHW-native plumbing (no transposes)
# ----------------------------------------------------------------------------
def pixel_coords(img_size):
    # torch.meshgrid default indexing='ij': g1 = row coord, g2 = col coord.
    lin = jnp.linspace(-1.0, 1.0, img_size)
    g1, g2 = jnp.meshgrid(lin, lin, indexing="ij")
    g1 = g1.reshape(1, 1, img_size, img_size)
    g2 = g2.reshape(1, 1, img_size, img_size)
    return jnp.concatenate((g1, g2), axis=1)          # (1, 2, H, W)


def make_semiconv_params(key, nin, nout, img_size, gate_init=0.5):
    kw, kb = jax.random.split(key)
    # Conv2d(nin, nout, 1): weight (nout, nin, 1, 1), bias (nout,).
    bound = 1.0 / jnp.sqrt(nin)
    w_oihw = jax.random.uniform(kw, (nout, nin, 1, 1), jnp.float32, -bound, bound)
    bias = jax.random.uniform(kb, (nout,), jnp.float32, -bound, bound)
    # ScalarGate default init is 0.0; use a nonzero deterministic value so the
    # conv path is actually exercised (semantics identical).
    gate = jnp.array(gate_init, jnp.float32)
    coords = pixel_coords(img_size)                               # (1, 2, H, W)
    zeros = jnp.zeros((1, nout - 2, img_size, img_size), jnp.float32)
    uv = jnp.concatenate((zeros, coords), axis=1)                 # reference only
    return dict(w_oihw=w_oihw, bias=bias, gate=gate, uv=uv)


@jax.jit
def semiconv_forward(params, x_nchw):
    """Matches SemiConv.forward: x NCHW -> (out + uv [NCHW], delta [N,2,H,W])."""
    N, Cin, H, W = x_nchw.shape
    w_oihw = params["w_oihw"]
    Cout = w_oihw.shape[0]
    gate = params["gate"]

    # Fold the scalar gate into the (tiny) weight and bias:
    #   gate*(W x + b) == (gate*W) x + gate*b
    w_g = w_oihw[:, :, 0, 0] * gate                               # (Cout, Cin)
    wt = jnp.transpose(w_g, (1, 0))[:, :, None]                   # (Cin, Cout, 1)
    b_g = (params["bias"] * gate).reshape(Cout, 1)                # (Cout, 1)

    HW = H * W
    tm = _pick_tile(HW)
    x_flat = x_nchw.reshape(N, Cin, HW)       # NCHW-native: free reshape only

    out_flat, delta_flat = semiconv_pallas(x_flat, wt, b_g, H=H, W=W, tm=tm)
    return out_flat.reshape(N, Cout, H, W), delta_flat.reshape(N, 2, H, W)


def semiconv_reference(params, x_nchw):
    """Pure-JAX reference mirroring the PyTorch forward."""
    w = params["w_oihw"][:, :, 0, 0]                              # (Cout, Cin)
    conv = jnp.einsum("nchw,oc->nohw", x_nchw, w) + params["bias"][None, :, None, None]
    out = params["gate"] * conv
    delta = out[:, -2:, :, :]
    return out + params["uv"], delta


if __name__ == "__main__":
    key = jax.random.PRNGKey(0)
    k_x, k_p = jax.random.split(key)

    N, Cin, Cout, IMG = 2, 4, 4, 16
    x = jax.random.normal(k_x, (N, Cin, IMG, IMG), jnp.float32)
    params = make_semiconv_params(k_p, Cin, Cout, IMG)

    out, delta = semiconv_forward(params, x)
    jax.block_until_ready((out, delta))

    ref_out, ref_delta = semiconv_reference(params, x)
    assert out.shape == (N, Cout, IMG, IMG) and delta.shape == (N, 2, IMG, IMG)
    assert jnp.allclose(out, ref_out, atol=1e-5, rtol=1e-5)
    assert jnp.allclose(delta, ref_delta, atol=1e-5, rtol=1e-5)

    print("KERNEL_OK")
</pallas_src>

<mosaic_0001>
module attributes {stable_mosaic.version = 11 : i64} {
  func.func @_semiconv_kernel(%arg0: i32, %arg1: i32, %arg2: memref<1x4x256xf32, #tpu.memory_space<vmem>>, %arg3: memref<4x4x1xf32, #tpu.memory_space<vmem>>, %arg4: memref<4x1xf32, #tpu.memory_space<vmem>>, %arg5: memref<1x4x256xf32, #tpu.memory_space<vmem>>, %arg6: memref<1x2x256xf32, #tpu.memory_space<vmem>>) attributes {dimension_semantics = [#tpu.dimension_semantics<parallel>, #tpu.dimension_semantics<parallel>], iteration_bounds = array<i64: 2, 1>, scalar_prefetch = 0 : i64, scratch_operands = 0 : i64, tpu.core_type = #tpu.core_type<tc>, window_params = [{transform_indices = @transform_0, window_bounds = array<i64: 1, 4, 256>}, {pipeline_mode = #tpu.pipeline_mode<synchronous>, transform_indices = @transform_1, window_bounds = array<i64: 4, 4, 1>}, {pipeline_mode = #tpu.pipeline_mode<synchronous>, transform_indices = @transform_2, window_bounds = array<i64: 4, 1>}, {transform_indices = @transform_3, window_bounds = array<i64: 1, 4, 256>}, {transform_indices = @transform_4, window_bounds = array<i64: 1, 2, 256>}]} {
    %c0 = arith.constant 0 : index
    %c0_0 = arith.constant 0 : index
    %c0_1 = arith.constant 0 : index
    %0 = vector.load %arg2[%c0, %c0_0, %c0_1] : memref<1x4x256xf32, #tpu.memory_space<vmem>>, vector<1x4x256xf32>
    %1 = vector.shape_cast %0 : vector<1x4x256xf32> to vector<4x256xf32>
    %c0_2 = arith.constant 0 : index
    %c0_3 = arith.constant 0 : index
    %c0_4 = arith.constant 0 : index
    %2 = vector.load %arg3[%c0_2, %c0_3, %c0_4] : memref<4x4x1xf32, #tpu.memory_space<vmem>>, vector<1x4x1xf32>
    %3 = vector.shape_cast %2 : vector<1x4x1xf32> to vector<4x1xf32>
    %4 = vector.extract_strided_slice %1 {offsets = [0, 0], sizes = [1, 256], strides = [1, 1]} : vector<4x256xf32> to vector<1x256xf32>
    %5 = vector.broadcast %3 : vector<4x1xf32> to vector<4x256xf32>
    %6 = vector.broadcast %4 : vector<1x256xf32> to vector<4x256xf32>
    %7 = arith.mulf %5, %6 : vector<4x256xf32>
    %c1 = arith.constant 1 : index
    %c0_5 = arith.constant 0 : index
    %c0_6 = arith.constant 0 : index
    %8 = vector.load %arg3[%c1, %c0_5, %c0_6] : memref<4x4x1xf32, #tpu.memory_space<vmem>>, vector<1x4x1xf32>
    %9 = vector.shape_cast %8 : vector<1x4x1xf32> to vector<4x1xf32>
    %10 = vector.extract_strided_slice %1 {offsets = [1, 0], sizes = [1, 256], strides = [1, 1]} : vector<4x256xf32> to vector<1x256xf32>
    %11 = vector.broadcast %9 : vector<4x1xf32> to vector<4x256xf32>
    %12 = vector.broadcast %10 : vector<1x256xf32> to vector<4x256xf32>
    %13 = arith.mulf %11, %12 : vector<4x256xf32>
    %14 = arith.addf %7, %13 : vector<4x256xf32>
    %c2 = arith.constant 2 : index
    %c0_7 = arith.constant 0 : index
    %c0_8 = arith.constant 0 : index
    %15 = vector.load %arg3[%c2, %c0_7, %c0_8] : memref<4x4x1xf32, #tpu.memory_space<vmem>>, vector<1x4x1xf32>
    %16 = vector.shape_cast %15 : vector<1x4x1xf32> to vector<4x1xf32>
    %17 = vector.extract_strided_slice %1 {offsets = [2, 0], sizes = [1, 256], strides = [1, 1]} : vector<4x256xf32> to vector<1x256xf32>
    %18 = vector.broadcast %16 : vector<4x1xf32> to vector<4x256xf32>
    %19 = vector.broadcast %17 : vector<1x256xf32> to vector<4x256xf32>
    %20 = arith.mulf %18, %19 : vector<4x256xf32>
    %21 = arith.addf %14, %20 : vector<4x256xf32>
    %c3 = arith.constant 3 : index
    %c0_9 = arith.constant 0 : index
    %c0_10 = arith.constant 0 : index
    %22 = vector.load %arg3[%c3, %c0_9, %c0_10] : memref<4x4x1xf32, #tpu.memory_space<vmem>>, vector<1x4x1xf32>
    %23 = vector.shape_cast %22 : vector<1x4x1xf32> to vector<4x1xf32>
    %24 = vector.extract_strided_slice %1 {offsets = [3, 0], sizes = [1, 256], strides = [1, 1]} : vector<4x256xf32> to vector<1x256xf32>
    %25 = vector.broadcast %23 : vector<4x1xf32> to vector<4x256xf32>
    %26 = vector.broadcast %24 : vector<1x256xf32> to vector<4x256xf32>
    %27 = arith.mulf %25, %26 : vector<4x256xf32>
    %28 = arith.addf %21, %27 : vector<4x256xf32>
    %c0_11 = arith.constant 0 : index
    %c0_12 = arith.constant 0 : index
    %29 = vector.load %arg4[%c0_11, %c0_12] : memref<4x1xf32, #tpu.memory_space<vmem>>, vector<4x1xf32>
    %30 = vector.broadcast %29 : vector<4x1xf32> to vector<4x256xf32>
    %31 = arith.addf %28, %30 : vector<4x256xf32>
    %32 = vector.extract_strided_slice %31 {offsets = [2, 0], sizes = [2, 256], strides = [1, 1]} : vector<4x256xf32> to vector<2x256xf32>
    %c0_13 = arith.constant 0 : index
    %c0_14 = arith.constant 0 : index
    %c0_15 = arith.constant 0 : index
    %33 = vector.load %arg6[%c0_13, %c0_14, %c0_15] : memref<1x2x256xf32, #tpu.memory_space<vmem>>, vector<1x2x256xf32>
    %34 = vector.shape_cast %33 : vector<1x2x256xf32> to vector<2x256xf32>
    %35 = vector.shape_cast %32 : vector<2x256xf32> to vector<1x2x256xf32>
    tpu.vector_store %arg6[%c0_13, %c0_14, %c0_15], %35 {strides = array<i32>} : memref<1x2x256xf32, #tpu.memory_space<vmem>>, vector<1x2x256xf32>,
    %c256_i32 = arith.constant 256 : i32
    %36 = arith.muli %arg1, %c256_i32 : i32
    %37 = tpu.iota {dimensions = array<i32: 1>} : vector<1x256xi32>
    %38 = vector.broadcast %36 : i32 to vector<1x256xi32>
    %39 = arith.addi %38, %37 : vector<1x256xi32>
    %40 = arith.sitofp %39 : vector<1x256xi32> to vector<1x256xf32>
    %cst = arith.constant 1.600000e+01 : f32
    %41 = vector.broadcast %cst : f32 to vector<1x256xf32>
    %42 = arith.divf %40, %41 : vector<1x256xf32>
    %43 = math.floor %42 : vector<1x256xf32>
    %cst_16 = arith.constant 1.600000e+01 : f32
    %44 = vector.broadcast %cst_16 : f32 to vector<1x256xf32>
    %45 = arith.mulf %43, %44 : vector<1x256xf32>
    %46 = arith.subf %40, %45 : vector<1x256xf32>
    %cst_17 = arith.constant 0.13333334 : f32
    %47 = vector.broadcast %cst_17 : f32 to vector<1x256xf32>
    %48 = arith.mulf %43, %47 : vector<1x256xf32>
    %cst_18 = arith.constant 1.000000e+00 : f32
    %49 = vector.broadcast %cst_18 : f32 to vector<1x256xf32>
    %50 = arith.subf %48, %49 : vector<1x256xf32>
    %cst_19 = arith.constant 0.13333334 : f32
    %51 = vector.broadcast %cst_19 : f32 to vector<1x256xf32>
    %52 = arith.mulf %46, %51 : vector<1x256xf32>
    %cst_20 = arith.constant 1.000000e+00 : f32
    %53 = vector.broadcast %cst_20 : f32 to vector<1x256xf32>
    %54 = arith.subf %52, %53 : vector<1x256xf32>
    %55 = tpu.iota {dimensions = array<i32: 0>} : vector<4x256xi32>
    %c2_i32 = arith.constant 2 : i32
    %56 = vector.broadcast %c2_i32 : i32 to vector<4x256xi32>
    %57 = arith.cmpi eq, %55, %56 : vector<4x256xi32>
    %cst_21 = arith.constant 0.000000e+00 : f32
    %58 = vector.shape_cast %50 : vector<1x256xf32> to vector<1x256xf32>
    %59 = vector.broadcast %58 : vector<1x256xf32> to vector<4x256xf32>
    %60 = vector.broadcast %cst_21 : f32 to vector<4x256xf32>
    %61 = arith.select %57, %59, %60 : vector<4x256xi1>, vector<4x256xf32>
    %c3_i32 = arith.constant 3 : i32
    %62 = vector.broadcast %c3_i32 : i32 to vector<4x256xi32>
    %63 = arith.cmpi eq, %55, %62 : vector<4x256xi32>
    %64 = vector.shape_cast %54 : vector<1x256xf32> to vector<1x256xf32>
    %65 = vector.broadcast %64 : vector<1x256xf32> to vector<4x256xf32>
    %66 = arith.select %63, %65, %61 : vector<4x256xi1>, vector<4x256xf32>
    %67 = arith.addf %31, %66 : vector<4x256xf32>
    %c0_22 = arith.constant 0 : index
    %c0_23 = arith.constant 0 : index
    %c0_24 = arith.constant 0 : index
    %68 = vector.load %arg5[%c0_22, %c0_23, %c0_24] : memref<1x4x256xf32, #tpu.memory_space<vmem>>, vector<1x4x256xf32>
    %69 = vector.shape_cast %68 : vector<1x4x256xf32> to vector<4x256xf32>
    %70 = vector.shape_cast %67 : vector<4x256xf32> to vector<1x4x256xf32>
    tpu.vector_store %arg5[%c0_22, %c0_23, %c0_24], %70 {strides = array<i32>} : memref<1x4x256xf32, #tpu.memory_space<vmem>>, vector<1x4x256xf32>,
    return
  }
  func.func @transform_0(%arg0: i32, %arg1: i32) -> (i32, i32, i32) {
    %c0_i32 = arith.constant 0 : i32
    %c0_i32_0 = arith.constant 0 : i32
    return %arg0, %c0_i32, %arg1 : i32, i32, i32
  }
  func.func @transform_1(%arg0: i32, %arg1: i32) -> (i32, i32, i32) {
    %c0_i32 = arith.constant 0 : i32
    %c0_i32_0 = arith.constant 0 : i32
    %c0_i32_1 = arith.constant 0 : i32
    %c0_i32_2 = arith.constant 0 : i32
    return %c0_i32, %c0_i32_0, %c0_i32_1 : i32, i32, i32
  }
  func.func @transform_2(%arg0: i32, %arg1: i32) -> (i32, i32) {
    %c0_i32 = arith.constant 0 : i32
    %c0_i32_0 = arith.constant 0 : i32
    %c0_i32_1 = arith.constant 0 : i32
    return %c0_i32, %c0_i32_0 : i32, i32
  }
  func.func @transform_3(%arg0: i32, %arg1: i32) -> (i32, i32, i32) {
    %c0_i32 = arith.constant 0 : i32
    %c0_i32_0 = arith.constant 0 : i32
    return %arg0, %c0_i32, %arg1 : i32, i32, i32
  }
  func.func @transform_4(%arg0: i32, %arg1: i32) -> (i32, i32, i32) {
    %c0_i32 = arith.constant 0 : i32
    %c0_i32_0 = arith.constant 0 : i32
    return %arg0, %c0_i32, %arg1 : i32, i32, i32
  }
}

</mosaic_0001>

<bundles_post_ra>
// kernel: semiconv_forward.1
= control target key start
LH: loop header
LB: loop body
LE: loop exit
PB: predicated region body
PF: predicated region fallthrough
CT: control target
= control target key end

     0   :  { %s635_s15 = smov 0   ;;  %s637_s16 = smov 0   ;;  %s700_s0 = inlined_call_operand.vmem [shape: f32[2,4,256], index: 0, kind: input, shape index: {}]   ;;  %s701_s1 = inlined_call_operand.vmem [shape: f32[4,4,1], index: 1, kind: input, shape index: {}]   ;;  %s702_s2 = inlined_call_operand.vmem [shape: f32[4,1], index: 2, kind: input, shape index: {}]   ;;  %s703_s3 = inlined_call_operand.vmem [shape: f32[2,4,256], index: 3, kind: output, shape index: {0}]   ;;  %s704_s4 = inlined_call_operand.vmem [shape: f32[2,2,256], index: 4, kind: output, shape index: {1}]  }
   0x1   :  { %s639_s17 = smov 0  }
   0x2 LB: > { %s27_s18 = sadd.s32 1, %s602_s16  ;;  %p534_p0 = scmp.ge.s32.totalorder %s606_s17, 1  ;;  %s606_s17 = sphi %s639_s17, %s15_s17   ;;  %s602_s16 = sphi %s637_s16, %s706_s16   ;;  %s598_s15 = sphi %s635_s15, %s705_s15  }
   0x3   : > { %p29_p1 = scmp.ge.s32.totalorder %s27_s18, 2  ;;  %p188_p2 = scmp.lt.s32.totalorder %s606_s17, 3 }
   0x5   : > { %s708_s18 = smov (%p29_p1, %s27_s18), 0  ;;  %p189_p3 = pnand %p534_p0, %p188_p2 }
   0x6   : > { %p232_p4 = scmp.lt.s32.totalorder (!%p189_p3), %s598_s15, 1 }
   0x7   : > { %192 = sbr.rel (%p189_p3) target bundleno = 157 (0x9d), region = 32 }
   0xc   : > { %v542_v0 = vld [vmem:[%s701_s1 + $0x8] sm:$0xf]  ;;  %v262_v1 = vld [vmem:[%s701_s1] sm:$0xf]  ;;  %v608_v2 = vmov 0   ;;  %v609_v6 = vmov 16.0   ;;  %v345_v9 = vlaneseq }
   0xd   : > { %580 = vset.pattern.permute.xlu1 %v608_v2  ;;  %579 = vset.pattern.permute.xlu0 %v608_v2  ;;  %v328_v3 = vld [vmem:[%s702_s2] sm:$0xf]  ;;  %v543_v4 = vld [vmem:[%s701_s1 + $0xc] sm:$0xf]  ;;  %v541_v5 = vld [vmem:[%s701_s1 + $0x4] sm:$0xf]  ;;  %582 = vrcp.f32 %v609_v6 }
   0xe   : > { %298 = vperm.xlu1 %580, %v542_v0   ;;  %265 = vperm.xlu0 %579, %v262_v1   ;;  %v346_v11 = vand.u32 127, %v345_v9  ;;  %s710_s15 = smov (!%p232_p4, %s598_s15), 1  ;;  %v377_v37 = vshrl.u32 %v345_v9, 7  ;;  %vm389_vm3 = vcmask 1043456  }
   0xf   : > { %581 = vset.pattern.permute.xlu2 %v608_v2  ;;  %s550_s29 = sshll.u32 %s710_s15, 3  ;;  %s552_s10 = sshll.u32 %s710_s15, 2 }
  0x10   : > { %331 = vperm.xlu2 %581, %v328_v3   ;;  %v347_v13 = vadd.s32 128, %v346_v11  ;;  %v351_v17 = vcvt.s32.f32 %v346_v11  ;;  %s239_s6 = scalar_lea.vmem %s700_s0, %s550_s29  ;;  %vm378_vm1 = vcmp.eq.s32.totalorder %v377_v37, 2  ;;  %vm381_vm2 = vcmp.eq.s32.totalorder %v377_v37, 3  ;;  %s249_s9 = scalar_lea.vmem %s703_s3, %s550_s29 }
  0x11   : > { %v261_v21 = vld [vmem:[%s239_s6] sm:$0xff]  ;;  %s259_s13 = scalar_lea.vmem %s704_s4, %s552_s10 }
  0x12   : > { %v352_v15 = vcvt.s32.f32 %v347_v13  ;;  %v269_v26 = vperm.slane %v261_v21, 0  ;;  %v270_v27 = vperm.slane %v261_v21, 4  ;;  %v284_v28 = vperm.slane %v261_v21, 1 }
  0x13   : > { %v583_v7 = vpop.eup %582  ;;  %v285_v29 = vperm.slane %v261_v21, 5  ;;  %v301_v31 = vperm.slane %v261_v21, 2  ;;  %v302_v32 = vperm.slane %v261_v21, 6  ;;  %v318_v33 = vperm.slane %v261_v21, 3 }
  0x14   : > { %v354_v8 = vmul.f32 16.0, %v583_v7  ;;  %vm358_vm0 = vweird.f32 %v583_v7  ;;  %v319_v34 = vperm.slane %v261_v21, 7  ;;  %v273_v38 = vperm.slane %v269_v26, 0 }
  0x15   : > { %v274_v39 = vperm.slane %v270_v27, 0  ;;  %v288_v40 = vperm.slane %v284_v28, 1  ;;  %v289_v41 = vperm.slane %v285_v29, 1  ;;  %v305_v44 = vperm.slane %v301_v31, 2 }
  0x16   : > { %315 = vperm.xlu1 %580, %v543_v4   ;;  %281 = vperm.xlu0 %579, %v541_v5   ;;  %v355_v10 = vsub.f32 1.0, %v354_v8  ;;  %v306_v45 = vperm.slane %v302_v32, 2  ;;  %v322_v46 = vperm.slane %v318_v33, 3  ;;  %v323_v47 = vperm.slane %v319_v34, 3 }
  0x18   : > { %v356_v12 = vmul.f32 %v583_v7, %v355_v10 }
  0x1a   : > { %v357_v14 = vadd.f32 %v583_v7, %v356_v12 }
  0x1c   : > { %v359_v16 = vsel %vm358_vm0, %v583_v7, %v357_v14 }
  0x1d   : > { %v361_v18 = vmul.f32 %v359_v16, %v352_v15  ;;  %v360_v19 = vmul.f32 %v359_v16, %v351_v17 }
  0x1f   : > { %v363_v20 = vfloor.f32 %v361_v18  ;;  %v362_v22 = vfloor.f32 %v360_v19 }
  0x21   : > { %v365_v25 = vmul.f32 16.0, %v363_v20  ;;  %v364_v30 = vmul.f32 16.0, %v362_v22  ;;  %v369_v36 = vmul.f32 0.13333334, %v363_v20  ;;  %v368_v43 = vmul.f32 0.13333334, %v362_v22 }
  0x23   : > { %v367_v35 = vsub.f32 %v352_v15, %v365_v25  ;;  %v366_v42 = vsub.f32 %v351_v17, %v364_v30  ;;  %v545_v49 = vadd.f32 -1.0, %v369_v36  ;;  %v544_v56 = vadd.f32 -1.0, %v368_v43 }
  0x25   : > { %v373_v50 = vmul.f32 0.13333334, %v367_v35  ;;  %v372_v57 = vmul.f32 0.13333334, %v366_v42  ;;  %v380_v63 = vsel %vm378_vm1, %v545_v49, 0.0  ;;  %v379_v6 = vsel %vm378_vm1, %v544_v56, 0.0 }
  0x27   : > { %v547_v62 = vadd.f32 -1.0, %v373_v50  ;;  %v546_v4 = vadd.f32 -1.0, %v372_v57 }
  0x29   : > { %v383_v9 = vsel %vm381_vm2, %v547_v62, %v380_v63  ;;  %v382_v12 = vsel %vm381_vm2, %v546_v4, %v379_v6 }
  0x6a   : > { %v332_v5 = vpop.permute.xlu2 %331 }
  0x80   : > { %v299_v23 = vpop.permute.xlu1 %298  ;;  %v266_v24 = vpop.permute.xlu0 %265 }
  0x81   : > { %v275_v51 = vmul.f32 %v273_v38, %v266_v24  ;;  %v276_v52 = vmul.f32 %v274_v39, %v266_v24  ;;  %v307_v58 = vmul.f32 %v305_v44, %v299_v23  ;;  %v308_v59 = vmul.f32 %v306_v45, %v299_v23 }
  0x88   : > { %v282_v48 = vpop.permute.xlu0 %281  ;;  %v316_v55 = vpop.permute.xlu1 %315 }
  0x89   : > { %v290_v53 = vmul.f32 %v288_v40, %v282_v48  ;;  %v291_v54 = vmul.f32 %v289_v41, %v282_v48  ;;  %v324_v0 = vmul.f32 %v322_v46, %v316_v55  ;;  %v325_v1 = vmul.f32 %v323_v47, %v316_v55 }
  0x8b   : > { %v292_v60 = vadd.f32 %v290_v53, %v275_v51  ;;  %v293_v61 = vadd.f32 %v291_v54, %v276_v52 }
  0x8d   : > { %v309_v2 = vadd.f32 %v307_v58, %v292_v60  ;;  %v310_v3 = vadd.f32 %v308_v59, %v293_v61 }
  0x8f   : > { %v326_v7 = vadd.f32 %v324_v0, %v309_v2  ;;  %v327_v8 = vadd.f32 %v325_v1, %v310_v3 }
  0x91   : > { %v334_v10 = vadd.f32 %v332_v5, %v326_v7  ;;  %v335_v11 = vadd.f32 %v332_v5, %v327_v8 }
  0x93   : > { %338 = vst.sshfl [vmem:[#allocation1] sm:$0xff pattern:$0x73625140] %v334_v10  ;;  %v385_v13 = vadd.f32 %v383_v9, %v335_v11  ;;  %v384_v14 = vadd.f32 %v382_v12, %v334_v10 }
  0x94   : > { %339 = vst.sshfl [vmem:[#allocation1 + $0x8] sm:$0xff pattern:$0x73625140] %v335_v11 }
  0x95   : > { %v388_v15 = vrot.slane %v385_v13, 4 }
  0x97   : > { %v390_v16 = vsel %vm389_vm3, %v384_v14, %v388_v15 }
  0x98   : > { %392 = vst [vmem:[%s249_s9] sm:$0xff] %v390_v16 }
  0x9b   : > { %v341_v17 = vld [vmem:[#allocation1 + $0x1] ss:$4 sm:$0xff] }
  0x9c   : > { %343 = vst [vmem:[%s259_s13] sm:$0xf] %v341_v17 }
  0x9d PF: > { %s15_s17 = sadd.s32 1, %s606_s17   ;;  %s705_s15 = smov %s602_s16 }
  0x9e   : > { %p12_p5 = scmp.ge.s32.totalorder %s15_s17, 4   ;;  %s706_s16 = smov %s708_s18 }
  0xa0   :  { %14 = sbr.rel (!%p12_p5) target bundleno = 2 (0x2), region = 78 }

</bundles_post_ra>
